<compile_context>
chip_gen: v7x
topology: tpu7x:2x2x1
jax: 0.10.0
libtpu: 0.0.40
codegen_flags: <defaults>
</compile_context>

<pallas_src>
import functools

import jax
import jax.numpy as jnp
from jax.experimental import pallas as pl
from jax.experimental.pallas import tpu as pltpu


def mha_kernel(x_ref, wqkv_ref, bqkv_ref, wo_ref, bo_ref, gamma_ref, beta_ref,
               out_ref, *, num_heads, d_k, seq_len, eps=1e-5):
    rows, D = x_ref.shape            # rows = block_b * seq_len
    H, S = num_heads, seq_len
    Bt = rows // S

    x = x_ref[...].astype(jnp.float32)           # f32 residual copy
    xb = x.astype(jnp.bfloat16)                  # bf16 MXU operand

    # Fused QKV projection: one MXU pass with N = 3*D, f32 accumulation + bias.
    qkv = jnp.dot(xb, wqkv_ref[...], preferred_element_type=jnp.float32)
    qkv = qkv + bqkv_ref[...]

    scale = 1.0 / (float(d_k) ** 0.5)
    q = qkv[:, :D] * scale                       # scale q (rows*D), not scores (H*S^2)
    k = qkv[:, D:2 * D]
    v = qkv[:, 2 * D:]

    def split_heads(t):
        # (rows, D) -> (Bt*H, S, d_k) via static lane slices + stack
        # (avoids a 4-D transpose; attention never crosses batch boundaries).
        t = t.astype(jnp.bfloat16)
        heads = [t[:, h * d_k:(h + 1) * d_k].reshape(Bt, S, d_k) for h in range(H)]
        return jnp.stack(heads, axis=1).reshape(Bt * H, S, d_k)

    qh, kh, vh = split_heads(q), split_heads(k), split_heads(v)

    # Scaled dot-product attention, batched over (batch*heads).
    scores = jnp.einsum("bqd,bkd->bqk", qh, kh,
                        preferred_element_type=jnp.float32)        # (Bt*H, S, S)
    scores = scores - jnp.max(scores, axis=-1, keepdims=True)
    p = jnp.exp(scores)
    p = p * pl.reciprocal(jnp.sum(p, axis=-1, keepdims=True), approx=True)
    ctx = jnp.einsum("bqk,bkd->bqd", p.astype(jnp.bfloat16), vh,
                     preferred_element_type=jnp.float32)           # (Bt*H, S, d_k)

    # Merge heads back to (rows, D): lane-concatenate the per-head slices.
    ctx4 = ctx.reshape(Bt, H, S, d_k)
    ctx2 = jnp.concatenate([ctx4[:, h] for h in range(H)], axis=-1).reshape(rows, D)

    # Output projection + residual + LayerNorm (f32 vector epilogue).
    out = jnp.dot(ctx2.astype(jnp.bfloat16), wo_ref[...],
                  preferred_element_type=jnp.float32) + bo_ref[...]
    y = out + x
    mean = jnp.mean(y, axis=-1, keepdims=True)
    var = jnp.mean((y - mean) ** 2, axis=-1, keepdims=True)
    yn = (y - mean) * jax.lax.rsqrt(var + eps)
    yn = yn * gamma_ref[...] + beta_ref[...]
    out_ref[...] = yn.astype(out_ref.dtype)


def _default_block_b(B):
    """Largest batch tile that still leaves >= 2 grid steps (pipelining / v7x megacore)."""
    if B <= 1:
        return 1
    for d in range(B // 2, 0, -1):
        if B % d == 0:
            return d
    return 1


def multi_head_attention(x, params, *, num_heads, block_b=None, eps=1e-5):
    """x: [B, S, D] (or [S, D]) float32. params: dict of f32 weights (see init_params)."""
    squeeze_output = (x.ndim == 2)
    if squeeze_output:
        x = x[None]
    B, S, D = x.shape
    assert D % num_heads == 0
    d_k = D // num_heads
    if block_b is None:
        block_b = _default_block_b(B)
    assert B % block_b == 0
    grid_b = B // block_b
    rows_per_block = block_b * S

    # Fused QKV weight/bias; bf16 weight copies feed the MXU, biases stay f32.
    wqkv = jnp.concatenate([params["wq"], params["wk"], params["wv"]],
                           axis=1).astype(jnp.bfloat16)            # (D, 3D)
    bqkv = jnp.concatenate([params["bq"], params["bk"], params["bv"]], axis=1)  # (1, 3D)
    wo = params["wo"].astype(jnp.bfloat16)
    bo, gamma, beta = params["bo"], params["gamma"], params["beta"]

    # 2-D activation slab (wrapper-side reshape is free); each step owns block_b*S rows.
    # TODO(synk): for D < 128 a lane-dense (B, S*D) out-slab is a further store-path
    #             lever, but it needs an in-kernel cross-tile reshape; the epilogue is
    #             tiny at these dims so the row-major slab is kept for robustness.
    x2 = x.reshape(B * S, D)

    kernel = functools.partial(mha_kernel, num_heads=num_heads, d_k=d_k,
                               seq_len=S, eps=eps)
    const2d = lambda shape: pl.BlockSpec(shape, lambda i: (0, 0))

    # VMEM budget derived from the actual block sizes (scoped defaults are 16/32 MiB).
    rows = rows_per_block
    bh = block_b * num_heads
    vmem_est = (
        2 * 2 * rows * D * 4                    # x-in / out blocks, double-buffered, f32
        + 2 * (4 * D * D * 2 + 6 * D * 4)       # fused weights (bf16) + biases, double-buffered
        + rows * 3 * D * (4 + 2)                # qkv f32 + bf16 head copies
        + bh * S * S * (4 + 4 + 2)              # scores f32, probs f32 + bf16
        + rows * D * (4 + 4 + 4 + 2)            # ctx / out / LayerNorm temporaries
    )
    vmem_limit = int(min(max(2 * vmem_est, 32 * 1024 * 1024), 64 * 1024 * 1024))

    cost = pl.CostEstimate(
        flops=8 * B * S * D * D + 4 * B * num_heads * S * S * d_k,
        transcendentals=B * num_heads * S * S,
        bytes_accessed=2 * B * S * D * 4 + 4 * D * D * 2 + 6 * D * 4,
    )

    out2 = pl.pallas_call(
        kernel,
        out_shape=jax.ShapeDtypeStruct((B * S, D), x.dtype),
        grid_spec=pltpu.PrefetchScalarGridSpec(
            num_scalar_prefetch=0,
            grid=(grid_b,),
            in_specs=[
                pl.BlockSpec((rows_per_block, D), lambda i: (i, 0)),   # x row-block
                const2d((D, 3 * D)),                                   # W_qkv (fused)
                const2d((1, 3 * D)),                                   # b_qkv (fused)
                const2d((D, D)),                                       # W_o
                const2d((1, D)),                                       # b_o
                const2d((1, D)),                                       # gamma
                const2d((1, D)),                                       # beta
            ],
            out_specs=pl.BlockSpec((rows_per_block, D), lambda i: (i, 0)),
        ),
        compiler_params=pltpu.CompilerParams(
            dimension_semantics=("parallel",),
            vmem_limit_bytes=vmem_limit),
        cost_estimate=cost,
    )(x2, wqkv, bqkv, wo, bo, gamma, beta)

    out = out2.reshape(B, S, D)
    return out[0] if squeeze_output else out


def init_params(key, d_model):
    """Deterministic synthetic parameters (PyTorch Linear-like, pre-transposed)."""
    ks = jax.random.split(key, 8)
    sc = 1.0 / (d_model ** 0.5)

    def lin(kw, kb):
        w = jax.random.uniform(kw, (d_model, d_model), jnp.float32, -sc, sc)  # (in, out)
        b = jax.random.uniform(kb, (1, d_model), jnp.float32, -sc, sc)
        return w, b

    wq, bq = lin(ks[0], ks[1])
    wk, bk = lin(ks[2], ks[3])
    wv, bv = lin(ks[4], ks[5])
    wo, bo = lin(ks[6], ks[7])
    gamma = jnp.ones((1, d_model), jnp.float32)
    beta = jnp.zeros((1, d_model), jnp.float32)
    return dict(wq=wq, bq=bq, wk=wk, bk=bk, wv=wv, bv=bv,
                wo=wo, bo=bo, gamma=gamma, beta=beta)


def reference_mha(x, params, *, num_heads):
    """Pure-JAX f32 reference mirroring the PyTorch forward (eval mode, no mask)."""
    B, S, D = x.shape
    d_k = D // num_heads
    q = x @ params["wq"] + params["bq"]
    k = x @ params["wk"] + params["bk"]
    v = x @ params["wv"] + params["bv"]

    def split(t):
        return t.reshape(B, S, num_heads, d_k).transpose(0, 2, 1, 3)

    q, k, v = split(q), split(k), split(v)
    scores = jnp.einsum("bhqd,bhkd->bhqk", q, k) / jnp.sqrt(jnp.float32(d_k))
    attn = jax.nn.softmax(scores, axis=-1)
    ctx = jnp.einsum("bhqk,bhkd->bhqd", attn, v)
    ctx = ctx.transpose(0, 2, 1, 3).reshape(B, S, D)
    out = ctx @ params["wo"] + params["bo"]
    y = out + x
    mean = jnp.mean(y, axis=-1, keepdims=True)
    var = jnp.mean((y - mean) ** 2, axis=-1, keepdims=True)
    yn = (y - mean) / jnp.sqrt(var + 1e-5)
    return yn * params["gamma"] + params["beta"]


if __name__ == "__main__":
    B, S, D, H = 2, 16, 64, 8

    key = jax.random.PRNGKey(0)
    kx, kp = jax.random.split(key)
    x = jax.random.normal(kx, (B, S, D), jnp.float32)
    params = init_params(kp, D)

    # Jit the wrapper so the weight casts / concatenations are folded, not re-run.
    mha = jax.jit(functools.partial(multi_head_attention, num_heads=H))
    out = jax.block_until_ready(mha(x, params))

    ref = jax.block_until_ready(reference_mha(x, params, num_heads=H))
    assert out.shape == (B, S, D)
    # Kernel uses bf16 MXU operands + approx reciprocal; reference is pure f32,
    # so tolerance is loosened accordingly (LayerNorm output is O(1)).
    max_err = float(jnp.max(jnp.abs(out - ref)))
    assert jnp.allclose(out, ref, atol=2e-2, rtol=2e-2), f"max abs err {max_err}"

    print("KERNEL_OK")
</pallas_src>

<mosaic_0001>
module attributes {stable_mosaic.version = 11 : i64} {
  func.func @mha_kernel(%arg0: i32, %arg1: memref<16x64xf32, #tpu.memory_space<vmem>>, %arg2: memref<64x192xbf16, #tpu.memory_space<vmem>>, %arg3: memref<1x192xf32, #tpu.memory_space<vmem>>, %arg4: memref<64x64xbf16, #tpu.memory_space<vmem>>, %arg5: memref<1x64xf32, #tpu.memory_space<vmem>>, %arg6: memref<1x64xf32, #tpu.memory_space<vmem>>, %arg7: memref<1x64xf32, #tpu.memory_space<vmem>>, %arg8: memref<16x64xf32, #tpu.memory_space<vmem>>) attributes {dimension_semantics = [#tpu.dimension_semantics<parallel>], iteration_bounds = array<i64: 2>, scalar_prefetch = 0 : i64, scratch_operands = 0 : i64, tpu.core_type = #tpu.core_type<tc>, window_params = [{transform_indices = @transform_0, window_bounds = array<i64: 16, 64>}, {pipeline_mode = #tpu.pipeline_mode<synchronous>, transform_indices = @transform_1, window_bounds = array<i64: 64, 192>}, {pipeline_mode = #tpu.pipeline_mode<synchronous>, transform_indices = @transform_2, window_bounds = array<i64: 1, 192>}, {pipeline_mode = #tpu.pipeline_mode<synchronous>, transform_indices = @transform_3, window_bounds = array<i64: 64, 64>}, {pipeline_mode = #tpu.pipeline_mode<synchronous>, transform_indices = @transform_4, window_bounds = array<i64: 1, 64>}, {pipeline_mode = #tpu.pipeline_mode<synchronous>, transform_indices = @transform_5, window_bounds = array<i64: 1, 64>}, {pipeline_mode = #tpu.pipeline_mode<synchronous>, transform_indices = @transform_6, window_bounds = array<i64: 1, 64>}, {transform_indices = @transform_7, window_bounds = array<i64: 16, 64>}]} {
    %c0 = arith.constant 0 : index
    %c0_0 = arith.constant 0 : index
    %0 = vector.load %arg1[%c0, %c0_0] : memref<16x64xf32, #tpu.memory_space<vmem>>, vector<16x64xf32>
    %1 = arith.truncf %0 : vector<16x64xf32> to vector<16x64xbf16>
    %c0_1 = arith.constant 0 : index
    %c0_2 = arith.constant 0 : index
    %2 = vector.load %arg2[%c0_1, %c0_2] : memref<64x192xbf16, #tpu.memory_space<vmem>>, vector<64x192xbf16>
    %cst = arith.constant dense<0.000000e+00> : vector<16x192xf32>
    %3 = tpu.matmul %1, %2, %cst {dimension_numbers = #tpu.dot_dimension_numbers<[1], [0], [0], [1], [0, 0, 1, 1], [], []>} : vector<16x64xbf16>, vector<64x192xbf16>, vector<16x192xf32> -> vector<16x192xf32>
    %c0_3 = arith.constant 0 : index
    %c0_4 = arith.constant 0 : index
    %4 = vector.load %arg3[%c0_3, %c0_4] : memref<1x192xf32, #tpu.memory_space<vmem>>, vector<1x192xf32>
    %5 = vector.broadcast %4 : vector<1x192xf32> to vector<16x192xf32>
    %6 = arith.addf %3, %5 : vector<16x192xf32>
    %7 = vector.extract_strided_slice %6 {offsets = [0, 0], sizes = [16, 64], strides = [1, 1]} : vector<16x192xf32> to vector<16x64xf32>
    %cst_5 = arith.constant 0.353553385 : f32
    %8 = vector.broadcast %cst_5 : f32 to vector<16x64xf32>
    %9 = arith.mulf %7, %8 : vector<16x64xf32>
    %10 = vector.extract_strided_slice %6 {offsets = [0, 64], sizes = [16, 64], strides = [1, 1]} : vector<16x192xf32> to vector<16x64xf32>
    %11 = vector.extract_strided_slice %6 {offsets = [0, 128], sizes = [16, 64], strides = [1, 1]} : vector<16x192xf32> to vector<16x64xf32>
    %12 = arith.truncf %9 : vector<16x64xf32> to vector<16x64xbf16>
    %13 = vector.extract_strided_slice %12 {offsets = [0, 0], sizes = [16, 8], strides = [1, 1]} : vector<16x64xbf16> to vector<16x8xbf16>
    %14 = vector.shape_cast %13 : vector<16x8xbf16> to vector<1x16x8xbf16>
    %15 = vector.extract_strided_slice %12 {offsets = [0, 8], sizes = [16, 8], strides = [1, 1]} : vector<16x64xbf16> to vector<16x8xbf16>
    %16 = vector.shape_cast %15 : vector<16x8xbf16> to vector<1x16x8xbf16>
    %17 = vector.extract_strided_slice %12 {offsets = [0, 16], sizes = [16, 8], strides = [1, 1]} : vector<16x64xbf16> to vector<16x8xbf16>
    %18 = vector.shape_cast %17 : vector<16x8xbf16> to vector<1x16x8xbf16>
    %19 = vector.extract_strided_slice %12 {offsets = [0, 24], sizes = [16, 8], strides = [1, 1]} : vector<16x64xbf16> to vector<16x8xbf16>
    %20 = vector.shape_cast %19 : vector<16x8xbf16> to vector<1x16x8xbf16>
    %21 = vector.extract_strided_slice %12 {offsets = [0, 32], sizes = [16, 8], strides = [1, 1]} : vector<16x64xbf16> to vector<16x8xbf16>
    %22 = vector.shape_cast %21 : vector<16x8xbf16> to vector<1x16x8xbf16>
    %23 = vector.extract_strided_slice %12 {offsets = [0, 40], sizes = [16, 8], strides = [1, 1]} : vector<16x64xbf16> to vector<16x8xbf16>
    %24 = vector.shape_cast %23 : vector<16x8xbf16> to vector<1x16x8xbf16>
    %25 = vector.extract_strided_slice %12 {offsets = [0, 48], sizes = [16, 8], strides = [1, 1]} : vector<16x64xbf16> to vector<16x8xbf16>
    %26 = vector.shape_cast %25 : vector<16x8xbf16> to vector<1x16x8xbf16>
    %27 = vector.extract_strided_slice %12 {offsets = [0, 56], sizes = [16, 8], strides = [1, 1]} : vector<16x64xbf16> to vector<16x8xbf16>
    %28 = vector.shape_cast %27 : vector<16x8xbf16> to vector<1x16x8xbf16>
    %29 = vector.shape_cast %14 : vector<1x16x8xbf16> to vector<1x1x16x8xbf16>
    %30 = vector.shape_cast %16 : vector<1x16x8xbf16> to vector<1x1x16x8xbf16>
    %31 = vector.shape_cast %18 : vector<1x16x8xbf16> to vector<1x1x16x8xbf16>
    %32 = vector.shape_cast %20 : vector<1x16x8xbf16> to vector<1x1x16x8xbf16>
    %33 = vector.shape_cast %22 : vector<1x16x8xbf16> to vector<1x1x16x8xbf16>
    %34 = vector.shape_cast %24 : vector<1x16x8xbf16> to vector<1x1x16x8xbf16>
    %35 = vector.shape_cast %26 : vector<1x16x8xbf16> to vector<1x1x16x8xbf16>
    %36 = vector.shape_cast %28 : vector<1x16x8xbf16> to vector<1x1x16x8xbf16>
    %37 = tpu.concatenate %29, %30, %31, %32, %33, %34, %35, %36 in 1 : vector<1x1x16x8xbf16>, vector<1x1x16x8xbf16>, vector<1x1x16x8xbf16>, vector<1x1x16x8xbf16>, vector<1x1x16x8xbf16>, vector<1x1x16x8xbf16>, vector<1x1x16x8xbf16>, vector<1x1x16x8xbf16> -> vector<1x8x16x8xbf16>
    %38 = vector.shape_cast %37 : vector<1x8x16x8xbf16> to vector<8x16x8xbf16>
    %39 = arith.truncf %10 : vector<16x64xf32> to vector<16x64xbf16>
    %40 = vector.extract_strided_slice %39 {offsets = [0, 0], sizes = [16, 8], strides = [1, 1]} : vector<16x64xbf16> to vector<16x8xbf16>
    %41 = vector.shape_cast %40 : vector<16x8xbf16> to vector<1x16x8xbf16>
    %42 = vector.extract_strided_slice %39 {offsets = [0, 8], sizes = [16, 8], strides = [1, 1]} : vector<16x64xbf16> to vector<16x8xbf16>
    %43 = vector.shape_cast %42 : vector<16x8xbf16> to vector<1x16x8xbf16>
    %44 = vector.extract_strided_slice %39 {offsets = [0, 16], sizes = [16, 8], strides = [1, 1]} : vector<16x64xbf16> to vector<16x8xbf16>
    %45 = vector.shape_cast %44 : vector<16x8xbf16> to vector<1x16x8xbf16>
    %46 = vector.extract_strided_slice %39 {offsets = [0, 24], sizes = [16, 8], strides = [1, 1]} : vector<16x64xbf16> to vector<16x8xbf16>
    %47 = vector.shape_cast %46 : vector<16x8xbf16> to vector<1x16x8xbf16>
    %48 = vector.extract_strided_slice %39 {offsets = [0, 32], sizes = [16, 8], strides = [1, 1]} : vector<16x64xbf16> to vector<16x8xbf16>
    %49 = vector.shape_cast %48 : vector<16x8xbf16> to vector<1x16x8xbf16>
    %50 = vector.extract_strided_slice %39 {offsets = [0, 40], sizes = [16, 8], strides = [1, 1]} : vector<16x64xbf16> to vector<16x8xbf16>
    %51 = vector.shape_cast %50 : vector<16x8xbf16> to vector<1x16x8xbf16>
    %52 = vector.extract_strided_slice %39 {offsets = [0, 48], sizes = [16, 8], strides = [1, 1]} : vector<16x64xbf16> to vector<16x8xbf16>
    %53 = vector.shape_cast %52 : vector<16x8xbf16> to vector<1x16x8xbf16>
    %54 = vector.extract_strided_slice %39 {offsets = [0, 56], sizes = [16, 8], strides = [1, 1]} : vector<16x64xbf16> to vector<16x8xbf16>
    %55 = vector.shape_cast %54 : vector<16x8xbf16> to vector<1x16x8xbf16>
    %56 = vector.shape_cast %41 : vector<1x16x8xbf16> to vector<1x1x16x8xbf16>
    %57 = vector.shape_cast %43 : vector<1x16x8xbf16> to vector<1x1x16x8xbf16>
    %58 = vector.shape_cast %45 : vector<1x16x8xbf16> to vector<1x1x16x8xbf16>
    %59 = vector.shape_cast %47 : vector<1x16x8xbf16> to vector<1x1x16x8xbf16>
    %60 = vector.shape_cast %49 : vector<1x16x8xbf16> to vector<1x1x16x8xbf16>
    %61 = vector.shape_cast %51 : vector<1x16x8xbf16> to vector<1x1x16x8xbf16>
    %62 = vector.shape_cast %53 : vector<1x16x8xbf16> to vector<1x1x16x8xbf16>
    %63 = vector.shape_cast %55 : vector<1x16x8xbf16> to vector<1x1x16x8xbf16>
    %64 = tpu.concatenate %56, %57, %58, %59, %60, %61, %62, %63 in 1 : vector<1x1x16x8xbf16>, vector<1x1x16x8xbf16>, vector<1x1x16x8xbf16>, vector<1x1x16x8xbf16>, vector<1x1x16x8xbf16>, vector<1x1x16x8xbf16>, vector<1x1x16x8xbf16>, vector<1x1x16x8xbf16> -> vector<1x8x16x8xbf16>
    %65 = vector.shape_cast %64 : vector<1x8x16x8xbf16> to vector<8x16x8xbf16>
    %66 = arith.truncf %11 : vector<16x64xf32> to vector<16x64xbf16>
    %67 = vector.extract_strided_slice %66 {offsets = [0, 0], sizes = [16, 8], strides = [1, 1]} : vector<16x64xbf16> to vector<16x8xbf16>
    %68 = vector.shape_cast %67 : vector<16x8xbf16> to vector<1x16x8xbf16>
    %69 = vector.extract_strided_slice %66 {offsets = [0, 8], sizes = [16, 8], strides = [1, 1]} : vector<16x64xbf16> to vector<16x8xbf16>
    %70 = vector.shape_cast %69 : vector<16x8xbf16> to vector<1x16x8xbf16>
    %71 = vector.extract_strided_slice %66 {offsets = [0, 16], sizes = [16, 8], strides = [1, 1]} : vector<16x64xbf16> to vector<16x8xbf16>
    %72 = vector.shape_cast %71 : vector<16x8xbf16> to vector<1x16x8xbf16>
    %73 = vector.extract_strided_slice %66 {offsets = [0, 24], sizes = [16, 8], strides = [1, 1]} : vector<16x64xbf16> to vector<16x8xbf16>
    %74 = vector.shape_cast %73 : vector<16x8xbf16> to vector<1x16x8xbf16>
    %75 = vector.extract_strided_slice %66 {offsets = [0, 32], sizes = [16, 8], strides = [1, 1]} : vector<16x64xbf16> to vector<16x8xbf16>
    %76 = vector.shape_cast %75 : vector<16x8xbf16> to vector<1x16x8xbf16>
    %77 = vector.extract_strided_slice %66 {offsets = [0, 40], sizes = [16, 8], strides = [1, 1]} : vector<16x64xbf16> to vector<16x8xbf16>
    %78 = vector.shape_cast %77 : vector<16x8xbf16> to vector<1x16x8xbf16>
    %79 = vector.extract_strided_slice %66 {offsets = [0, 48], sizes = [16, 8], strides = [1, 1]} : vector<16x64xbf16> to vector<16x8xbf16>
    %80 = vector.shape_cast %79 : vector<16x8xbf16> to vector<1x16x8xbf16>
    %81 = vector.extract_strided_slice %66 {offsets = [0, 56], sizes = [16, 8], strides = [1, 1]} : vector<16x64xbf16> to vector<16x8xbf16>
    %82 = vector.shape_cast %81 : vector<16x8xbf16> to vector<1x16x8xbf16>
    %83 = vector.shape_cast %68 : vector<1x16x8xbf16> to vector<1x1x16x8xbf16>
    %84 = vector.shape_cast %70 : vector<1x16x8xbf16> to vector<1x1x16x8xbf16>
    %85 = vector.shape_cast %72 : vector<1x16x8xbf16> to vector<1x1x16x8xbf16>
    %86 = vector.shape_cast %74 : vector<1x16x8xbf16> to vector<1x1x16x8xbf16>
    %87 = vector.shape_cast %76 : vector<1x16x8xbf16> to vector<1x1x16x8xbf16>
    %88 = vector.shape_cast %78 : vector<1x16x8xbf16> to vector<1x1x16x8xbf16>
    %89 = vector.shape_cast %80 : vector<1x16x8xbf16> to vector<1x1x16x8xbf16>
    %90 = vector.shape_cast %82 : vector<1x16x8xbf16> to vector<1x1x16x8xbf16>
    %91 = tpu.concatenate %83, %84, %85, %86, %87, %88, %89, %90 in 1 : vector<1x1x16x8xbf16>, vector<1x1x16x8xbf16>, vector<1x1x16x8xbf16>, vector<1x1x16x8xbf16>, vector<1x1x16x8xbf16>, vector<1x1x16x8xbf16>, vector<1x1x16x8xbf16>, vector<1x1x16x8xbf16> -> vector<1x8x16x8xbf16>
    %92 = vector.shape_cast %91 : vector<1x8x16x8xbf16> to vector<8x16x8xbf16>
    "tpu.trace_start"() <{level = 10 : i32, message = "bqd,bkd->bqk"}> : () -> ()
    %cst_6 = arith.constant dense<0.000000e+00> : vector<8x16x16xf32>
    %93 = tpu.matmul %38, %65, %cst_6 {dimension_numbers = #tpu.dot_dimension_numbers<[2], [2], [1], [1], [0, 0, 0, 1, 1, 1], [0], [0]>} : vector<8x16x8xbf16>, vector<8x16x8xbf16>, vector<8x16x16xf32> -> vector<8x16x16xf32>
    "tpu.trace_stop"() : () -> ()
    %cst_7 = arith.constant dense<0xFF800000> : vector<8x16xf32>
    %94 = vector.multi_reduction <maximumf>, %93, %cst_7 [2] : vector<8x16x16xf32> to vector<8x16xf32>
    %95 = vector.shape_cast %94 : vector<8x16xf32> to vector<8x16x1xf32>
    %96 = vector.broadcast %95 : vector<8x16x1xf32> to vector<8x16x16xf32>
    %97 = arith.subf %93, %96 : vector<8x16x16xf32>
    %98 = math.exp %97 : vector<8x16x16xf32>
    %cst_8 = arith.constant dense<0.000000e+00> : vector<8x16xf32>
    %99 = vector.multi_reduction <add>, %98, %cst_8 [2] : vector<8x16x16xf32> to vector<8x16xf32>
    %100 = vector.shape_cast %99 : vector<8x16xf32> to vector<8x16x1xf32>
    %101 = tpu.reciprocal %100 {approx = true} : vector<8x16x1xf32> -> vector<8x16x1xf32>
    %102 = vector.broadcast %101 : vector<8x16x1xf32> to vector<8x16x16xf32>
    %103 = arith.mulf %98, %102 : vector<8x16x16xf32>
    %104 = arith.truncf %103 : vector<8x16x16xf32> to vector<8x16x16xbf16>
    "tpu.trace_start"() <{level = 10 : i32, message = "bqk,bkd->bqd"}> : () -> ()
    %cst_9 = arith.constant dense<0.000000e+00> : vector<8x16x8xf32>
    %105 = tpu.matmul %104, %92, %cst_9 {dimension_numbers = #tpu.dot_dimension_numbers<[2], [1], [1], [2], [0, 0, 0, 1, 1, 2], [0], [0]>} : vector<8x16x16xbf16>, vector<8x16x8xbf16>, vector<8x16x8xf32> -> vector<8x16x8xf32>
    "tpu.trace_stop"() : () -> ()
    %106 = vector.shape_cast %105 : vector<8x16x8xf32> to vector<1x8x16x8xf32>
    %107 = vector.extract_strided_slice %106 {offsets = [0, 0, 0, 0], sizes = [1, 1, 16, 8], strides = [1, 1, 1, 1]} : vector<1x8x16x8xf32> to vector<1x1x16x8xf32>
    %108 = vector.shape_cast %107 : vector<1x1x16x8xf32> to vector<1x16x8xf32>
    %109 = vector.extract_strided_slice %106 {offsets = [0, 1, 0, 0], sizes = [1, 1, 16, 8], strides = [1, 1, 1, 1]} : vector<1x8x16x8xf32> to vector<1x1x16x8xf32>
    %110 = vector.shape_cast %109 : vector<1x1x16x8xf32> to vector<1x16x8xf32>
    %111 = vector.extract_strided_slice %106 {offsets = [0, 2, 0, 0], sizes = [1, 1, 16, 8], strides = [1, 1, 1, 1]} : vector<1x8x16x8xf32> to vector<1x1x16x8xf32>
    %112 = vector.shape_cast %111 : vector<1x1x16x8xf32> to vector<1x16x8xf32>
    %113 = vector.extract_strided_slice %106 {offsets = [0, 3, 0, 0], sizes = [1, 1, 16, 8], strides = [1, 1, 1, 1]} : vector<1x8x16x8xf32> to vector<1x1x16x8xf32>
    %114 = vector.shape_cast %113 : vector<1x1x16x8xf32> to vector<1x16x8xf32>
    %115 = vector.extract_strided_slice %106 {offsets = [0, 4, 0, 0], sizes = [1, 1, 16, 8], strides = [1, 1, 1, 1]} : vector<1x8x16x8xf32> to vector<1x1x16x8xf32>
    %116 = vector.shape_cast %115 : vector<1x1x16x8xf32> to vector<1x16x8xf32>
    %117 = vector.extract_strided_slice %106 {offsets = [0, 5, 0, 0], sizes = [1, 1, 16, 8], strides = [1, 1, 1, 1]} : vector<1x8x16x8xf32> to vector<1x1x16x8xf32>
    %118 = vector.shape_cast %117 : vector<1x1x16x8xf32> to vector<1x16x8xf32>
    %119 = vector.extract_strided_slice %106 {offsets = [0, 6, 0, 0], sizes = [1, 1, 16, 8], strides = [1, 1, 1, 1]} : vector<1x8x16x8xf32> to vector<1x1x16x8xf32>
    %120 = vector.shape_cast %119 : vector<1x1x16x8xf32> to vector<1x16x8xf32>
    %121 = vector.extract_strided_slice %106 {offsets = [0, 7, 0, 0], sizes = [1, 1, 16, 8], strides = [1, 1, 1, 1]} : vector<1x8x16x8xf32> to vector<1x1x16x8xf32>
    %122 = vector.shape_cast %121 : vector<1x1x16x8xf32> to vector<1x16x8xf32>
    %123 = tpu.concatenate %108, %110, %112, %114, %116, %118, %120, %122 in 2 : vector<1x16x8xf32>, vector<1x16x8xf32>, vector<1x16x8xf32>, vector<1x16x8xf32>, vector<1x16x8xf32>, vector<1x16x8xf32>, vector<1x16x8xf32>, vector<1x16x8xf32> -> vector<1x16x64xf32>
    %124 = vector.shape_cast %123 : vector<1x16x64xf32> to vector<16x64xf32>
    %125 = arith.truncf %124 : vector<16x64xf32> to vector<16x64xbf16>
    %c0_10 = arith.constant 0 : index
    %c0_11 = arith.constant 0 : index
    %126 = vector.load %arg4[%c0_10, %c0_11] : memref<64x64xbf16, #tpu.memory_space<vmem>>, vector<64x64xbf16>
    %cst_12 = arith.constant dense<0.000000e+00> : vector<16x64xf32>
    %127 = tpu.matmul %125, %126, %cst_12 {dimension_numbers = #tpu.dot_dimension_numbers<[1], [0], [0], [1], [0, 0, 1, 1], [], []>} : vector<16x64xbf16>, vector<64x64xbf16>, vector<16x64xf32> -> vector<16x64xf32>
    %c0_13 = arith.constant 0 : index
    %c0_14 = arith.constant 0 : index
    %128 = vector.load %arg5[%c0_13, %c0_14] : memref<1x64xf32, #tpu.memory_space<vmem>>, vector<1x64xf32>
    %129 = vector.broadcast %128 : vector<1x64xf32> to vector<16x64xf32>
    %130 = arith.addf %127, %129 : vector<16x64xf32>
    %131 = arith.addf %130, %0 : vector<16x64xf32>
    %cst_15 = arith.constant dense<0.000000e+00> : vector<16xf32>
    %132 = vector.multi_reduction <add>, %131, %cst_15 [1] : vector<16x64xf32> to vector<16xf32>
    %133 = vector.shape_cast %132 : vector<16xf32> to vector<16x1xf32>
    %cst_16 = arith.constant 6.400000e+01 : f32
    %134 = vector.broadcast %cst_16 : f32 to vector<16x1xf32>
    %135 = arith.divf %133, %134 : vector<16x1xf32>
    %136 = vector.broadcast %135 : vector<16x1xf32> to vector<16x64xf32>
    %137 = arith.subf %131, %136 : vector<16x64xf32>
    %138 = arith.mulf %137, %137 : vector<16x64xf32>
    %cst_17 = arith.constant dense<0.000000e+00> : vector<16xf32>
    %139 = vector.multi_reduction <add>, %138, %cst_17 [1] : vector<16x64xf32> to vector<16xf32>
    %140 = vector.shape_cast %139 : vector<16xf32> to vector<16x1xf32>
    %cst_18 = arith.constant 6.400000e+01 : f32
    %141 = vector.broadcast %cst_18 : f32 to vector<16x1xf32>
    %142 = arith.divf %140, %141 : vector<16x1xf32>
    %143 = vector.broadcast %135 : vector<16x1xf32> to vector<16x64xf32>
    %144 = arith.subf %131, %143 : vector<16x64xf32>
    %cst_19 = arith.constant 9.99999974E-6 : f32
    %145 = vector.broadcast %cst_19 : f32 to vector<16x1xf32>
    %146 = arith.addf %142, %145 : vector<16x1xf32>
    %147 = math.rsqrt %146 : vector<16x1xf32>
    %148 = vector.broadcast %147 : vector<16x1xf32> to vector<16x64xf32>
    %149 = arith.mulf %144, %148 : vector<16x64xf32>
    %c0_20 = arith.constant 0 : index
    %c0_21 = arith.constant 0 : index
    %150 = vector.load %arg6[%c0_20, %c0_21] : memref<1x64xf32, #tpu.memory_space<vmem>>, vector<1x64xf32>
    %151 = vector.broadcast %150 : vector<1x64xf32> to vector<16x64xf32>
    %152 = arith.mulf %149, %151 : vector<16x64xf32>
    %c0_22 = arith.constant 0 : index
    %c0_23 = arith.constant 0 : index
    %153 = vector.load %arg7[%c0_22, %c0_23] : memref<1x64xf32, #tpu.memory_space<vmem>>, vector<1x64xf32>
    %154 = vector.broadcast %153 : vector<1x64xf32> to vector<16x64xf32>
    %155 = arith.addf %152, %154 : vector<16x64xf32>
    %c0_24 = arith.constant 0 : index
    %c0_25 = arith.constant 0 : index
    %156 = vector.load %arg8[%c0_24, %c0_25] : memref<16x64xf32, #tpu.memory_space<vmem>>, vector<16x64xf32>
    tpu.vector_store %arg8[%c0_24, %c0_25], %155 {strides = array<i32>} : memref<16x64xf32, #tpu.memory_space<vmem>>, vector<16x64xf32>,
    return
  }
  func.func @transform_0(%arg0: i32) -> (i32, i32) {
    %c0_i32 = arith.constant 0 : i32
    %c0_i32_0 = arith.constant 0 : i32
    return %arg0, %c0_i32 : i32, i32
  }
  func.func @transform_1(%arg0: i32) -> (i32, i32) {
    %c0_i32 = arith.constant 0 : i32
    %c0_i32_0 = arith.constant 0 : i32
    %c0_i32_1 = arith.constant 0 : i32
    return %c0_i32, %c0_i32_0 : i32, i32
  }
  func.func @transform_2(%arg0: i32) -> (i32, i32) {
    %c0_i32 = arith.constant 0 : i32
    %c0_i32_0 = arith.constant 0 : i32
    %c0_i32_1 = arith.constant 0 : i32
    return %c0_i32, %c0_i32_0 : i32, i32
  }
  func.func @transform_3(%arg0: i32) -> (i32, i32) {
    %c0_i32 = arith.constant 0 : i32
    %c0_i32_0 = arith.constant 0 : i32
    %c0_i32_1 = arith.constant 0 : i32
    return %c0_i32, %c0_i32_0 : i32, i32
  }
  func.func @transform_4(%arg0: i32) -> (i32, i32) {
    %c0_i32 = arith.constant 0 : i32
    %c0_i32_0 = arith.constant 0 : i32
    %c0_i32_1 = arith.constant 0 : i32
    return %c0_i32, %c0_i32_0 : i32, i32
  }
  func.func @transform_5(%arg0: i32) -> (i32, i32) {
    %c0_i32 = arith.constant 0 : i32
    %c0_i32_0 = arith.constant 0 : i32
    %c0_i32_1 = arith.constant 0 : i32
    return %c0_i32, %c0_i32_0 : i32, i32
  }
  func.func @transform_6(%arg0: i32) -> (i32, i32) {
    %c0_i32 = arith.constant 0 : i32
    %c0_i32_0 = arith.constant 0 : i32
    %c0_i32_1 = arith.constant 0 : i32
    return %c0_i32, %c0_i32_0 : i32, i32
  }
  func.func @transform_7(%arg0: i32) -> (i32, i32) {
    %c0_i32 = arith.constant 0 : i32
    %c0_i32_0 = arith.constant 0 : i32
    return %arg0, %c0_i32 : i32, i32
  }
}

</mosaic_0001>

<bundles_post_ra>
// kernel: multi_head_attention.1
= control target key start
LH: loop header
LB: loop body
LE: loop exit
PB: predicated region body
PF: predicated region fallthrough
CT: control target
= control target key end

     0   :  { %12 = vsyncpa [#allocation3], 0  ;;  %s2601_s0 = inlined_call_operand.vmem [shape: f32[32,64], index: 0, kind: input, shape index: {}]   ;;  %s2602_s1 = inlined_call_operand.vmem [shape: bf16[64,192], index: 1, kind: input, shape index: {}]   ;;  %s2603_s2 = inlined_call_operand.vmem [shape: f32[1,192], index: 2, kind: input, shape index: {}]   ;;  %s2604_s3 = inlined_call_operand.vmem [shape: bf16[64,64], index: 3, kind: input, shape index: {}]   ;;  %s2605_s4 = inlined_call_operand.vmem [shape: f32[1,64], index: 4, kind: input, shape index: {}]   ;;  %s2606_s5 = inlined_call_operand.vmem [shape: f32[1,64], index: 5, kind: input, shape index: {}]   ;;  %s2607_s6 = inlined_call_operand.vmem [shape: f32[1,64], index: 6, kind: input, shape index: {}]   ;;  %s2608_s7 = inlined_call_operand.hbm [shape: f32[32,64], index: 7, kind: output, shape index: {}]  }
   0x1   :  { %14 = vsyncpa [#allocation3 + $0x1], 0  ;;  %s2156_s24 = smov 0   ;;  %s2158_s25 = smov 0  }
   0x2   :  { %s2160_s26 = smov 0   ;;  %s2162_s27 = smov 0  }
   0x3 LB: > { %s2177_s28 = sadd.s32 4294967295, %s2094_s27   ;;  %s1662_s29 = sadd.s32 4294967294, %s2094_s27   ;;  %s2094_s27 = sphi %s2162_s27, %s2614_s27   ;;  %s2090_s26 = sphi %s2160_s26, %s2613_s26   ;;  %s2086_s25 = sphi %s2158_s25, %s2612_s25   ;;  %s2082_s24 = sphi %s2156_s24, %s2611_s24  }
   0x4   : > { %s2181_s30 = sadd.s32 1, %s2094_s27   ;;  %s179_s8 = sadd.s32 1, %s2090_s26 }
   0x5   : > { %s176_s9 = ssub.s32 %s2094_s27, %s2181_s30  ;;  %p189_p0 = scmp.ne.s32.totalorder %s2090_s26, %s2086_s25 }
   0x6   : > { %p177_p1 = scmp.eq.s32.totalorder %s176_s9, 0  ;;  %p190_p2 = scmp.eq.s32.totalorder %s2177_s28, 1 }
   0x7   : > { %p195_p3 = scmp.ne.s32.totalorder %s2086_s25, %s2082_s24  ;;  %p196_p4 = scmp.eq.s32.totalorder %s1662_s29, 1 }
   0x8   : > { %s2192_s10 = scalar_select %p177_p1, %s2090_s26, %s179_s8  }
   0x9   : > { %p2194_p5 = por %p190_p2, %p189_p0  ;;  %p2198_p6 = por %p196_p4, %p195_p3 }
   0xa   : > { %p1665_p7 = scmp.ge.s32.totalorder %s2094_s27, 1  ;;  %p241_p8 = scmp.lt.s32.totalorder %s2094_s27, 3 }
   0xc   : > { %p242_p9 = pnand %p1665_p7, %p241_p8 }
   0xd   : > { %v1946_v0 = vld [vmem:[%s2602_s1 + $0x4] ss:$8 sps:$4 sm:$0xff] (!%p242_p9)   ;;  %s1667_s15 = sshll.u32 (!%p242_p9), %s2177_s28, 1  ;;  %v1948_v1 = vld [vmem:[%s2602_s1] ss:$8 sps:$4 sm:$0xff] (!%p242_p9)   ;;  %v2096_v2 = vmov (!%p242_p9), 0   ;;  %v294_v12 = vlaneseq (!%p242_p9) }
   0xe   : > { %245 = sbr.rel (%p242_p9) target bundleno = 1981 (0x7bd), region = 48  ;;  %380 = vmatprep.mubr.bf16.mxu0 (!%p242_p9), %v2096_v2  ;;  %p274_p10 = scmp.lt.s32.totalorder (!%p242_p9), %s1667_s15, 3  ;;  %348 = vmatprep.subr.bf16.mxu0 (!%p242_p9), %v1946_v0  ;;  %v1949_v3 = vld [vmem:[%s2602_s1 + $0x14] ss:$8 sps:$4 sm:$0xff] (!%p242_p9)   ;;  %v1951_v4 = vld [vmem:[%s2602_s1 + $0x10] ss:$8 sps:$4 sm:$0xff] (!%p242_p9)  }
   0xf   : > { %349 = vmatpush1.bf16.msra.mxu0 (!%p242_p9), %v1948_v1  ;;  %v1952_v5 = vld [vmem:[%s2602_s1 + $0x24] ss:$8 sps:$4 sm:$0xff] (!%p242_p9)   ;;  %v1954_v6 = vld [vmem:[%s2602_s1 + $0x20] ss:$8 sps:$4 sm:$0xff] (!%p242_p9)   ;;  %v1955_v7 = vld [vmem:[%s2602_s1 + $0x34] ss:$8 sps:$4 sm:$0xff] (!%p242_p9)  }
  0x10   : > { %350 = vmatprep.subr.bf16.mxu0 (!%p242_p9), %v1949_v3  ;;  %v1957_v8 = vld [vmem:[%s2602_s1 + $0x30] ss:$8 sps:$4 sm:$0xff] (!%p242_p9)   ;;  %vm344_vm0 = vcmask (!%p242_p9), 523264   ;;  %v295_v13 = vshrl.u32 (!%p242_p9), %v294_v12, 7  ;;  %v292_v15 = vld [vmem:[%s2603_s2] sm:$0x3] (!%p242_p9) }
  0x11   : > { %v2097_v31 = vmov (!%p242_p9), 0.0   ;;  %s2098_s22 = smov (!%p242_p9), 104   ;;  %s2099_s23 = smov (!%p242_p9), 120   ;;  %vm2102_vm1 = vmmov (!%p242_p9), 0   ;;  %vm450_vm2 = vcmask (!%p242_p9), 64512   ;;  %vm841_vm3 = vcmask (!%p242_p9), 130048  }
  0x12   : > { %v296_v14 = vsub.s32 (!%p242_p9), 0, %v295_v13  ;;  %v300_v16 = vsub.s32 (!%p242_p9), 1, %v295_v13  ;;  %1745 = vmatprep.subr.bf16.mxu1 (!%p242_p9), %v2097_v31  ;;  %s2101_s8 = smov (!%p242_p9), 112   ;;  %1747 = vmatprep.mubr.msk.bf16.mxu1 (!%p242_p9), %vm2102_vm1, %v2097_v31  ;;  %s2103_s9 = smov (!%p242_p9), 80   ;;  %vm1438_vm4 = vcmask (!%p242_p9), 195584   ;;  %vm1441_vm5 = vcmask (!%p242_p9), 261120  }
  0x13   : > { %351 = vmatpush1.bf16.msra.mxu0 (!%p242_p9), %v1951_v4  ;;  %s2104_s13 = smov (!%p242_p9), 88   ;;  %s2105_s14 = smov (!%p242_p9), 64   ;;  %vm1444_vm6 = vcmask (!%p242_p9), 326656   ;;  %vm1447_vm7 = vcmask (!%p242_p9), 392192   ;;  %vm1450_vm8 = vcmask (!%p242_p9), 457728  }
  0x14   : > { %352 = vmatprep.subr.bf16.mxu0 (!%p242_p9), %v1952_v5  ;;  %v297_v17 = vrot.slane (!%p242_p9), %v292_v15, %v296_v14  ;;  %v301_v19 = vrot.slane (!%p242_p9), %v292_v15, %v300_v16  ;;  %s2106_s16 = smov (!%p242_p9), 72   ;;  %s2107_s17 = smov (!%p242_p9), 8  }
  0x15   : > { %s2616_s15 = smov (!%p274_p10, %s1667_s15), 3  ;;  %s2108_s19 = smov 16  }
  0x16   : > { %s1668_s29 = sshll.u32 %s2616_s15, 3  ;;  %s2109_s21 = smov 32  }
  0x17   : > { %s2229_s18 = scalar_lea.vmem %s2601_s0, %s1668_s29  ;;  %353 = vmatpush1.bf16.msra.mxu0 %v1954_v6  ;;  %s2100_s29 = smov 96  }
  0x18   : > { %v281_v9 = vld [vmem:[%s2229_s18] sm:$0xff]  ;;  %v282_v10 = vld [vmem:[%s2229_s18 + $0x8] sm:$0xff]  ;;  %354 = vmatprep.subr.bf16.mxu0 %v1955_v7  ;;  %s2113_s15 = smov 56  }
  0x19   : > { %v283_v11 = vpack.c.bf16 %v282_v10, %v281_v9 }
  0x1b   : > { %355 = vmatpush1.bf16.msra.mxu0 %v1957_v8 }
  0x1c   : > { %1769 = vmatprep.subr.bf16.mxu0 %v2097_v31 }
  0x1e   : > { %1677 = vmatmul.mubr.msk.bf16.vlgmr.msra.gmra.mrb[0].mxu0 %vm344_vm0, %v283_v11 }
  0x1f   : > { %1771 = vmatprep.mubr.msk.bf16.mxu0 %vm2102_vm1, %v2097_v31 }
  0xf1   : > { %v382_v18 = vpop.f32.mrb[0].mxu0 }
  0xf2   : > { %v383_v20 = vadd.f32 %v382_v18, %v297_v17  ;;  %v384_v21 = vpop.f32.mrb[1].mxu0 }
  0xf3   : > { %v386_v22 = vpop.f32.mrb[2].mxu0  ;;  %v385_v25 = vadd.f32 %v384_v21, %v301_v19 }
  0xf4   : > { %v387_v23 = vadd.f32 %v386_v22, %v297_v17  ;;  %v388_v24 = vpop.f32.mrb[3].mxu0  ;;  %v391_v27 = vmul.f32 0.35355338, %v383_v20 }
  0xf5   : > { %v389_v26 = vadd.f32 %v388_v24, %v301_v19 }
  0xf6   : > { %v392_v28 = vmul.f32 0.35355338, %v387_v23  ;;  %v409_v29 = vpack.c.bf16 %v387_v23, %v383_v20 }
  0xf7   : > { %v2240_v30 = vpack.c.bf16 %v389_v26, %v385_v25 }
  0xf8   : > { %v393_v32 = vpack.c.bf16 %v392_v28, %v391_v27  ;;  %415 = vrot.lane.b32.xlu1 %v409_v29, %s2098_s22  ;;  %411 = vrot.lane.b32.xlu0 %v409_v29, %s2099_s23 }
  0xfc   : > { %417 = vrot.lane.b32.xlu1 %v409_v29, %s2100_s29  ;;  %413 = vrot.lane.b32.xlu0 %v409_v29, %s2101_s8 }
 0x100   : > { %421 = vrot.lane.b32.xlu1 %v409_v29, %s2103_s9  ;;  %419 = vrot.lane.b32.xlu0 %v409_v29, %s2104_s13 }
 0x104   : > { %448 = vrot.lane.b32.xlu1 %v409_v29, %s2105_s14  ;;  %423 = vrot.lane.b32.xlu0 %v409_v29, %s2106_s16 }
 0x108   : > { %395 = vrot.lane.b32.xlu1 %v393_v32, %s2099_s23 }
 0x10c   : > { %397 = vrot.lane.b32.xlu1 %v393_v32, %s2101_s8 }
 0x16a   : > { %v416_v33 = vpop.permute.xlu1 %415  ;;  %v412_v34 = vpop.permute.xlu0 %411 }
 0x16b   : > { %498 = vrot.lane.b32.xlu0 %v412_v34, %s2105_s14 }
 0x16e   : > { %v418_v35 = vpop.permute.xlu1 %417  ;;  %v414_v36 = vpop.permute.xlu0 %413 }
 0x16f   : > { %547 = vrot.lane.b32.xlu0 %v414_v36, %s2105_s14  ;;  %645 = vrot.lane.b32.xlu1 %v418_v35, %s2105_s14 }
 0x172   : > { %v422_v37 = vpop.permute.xlu1 %421  ;;  %v420_v38 = vpop.permute.xlu0 %419 }
 0x173   : > { %596 = vrot.lane.b32.xlu0 %v416_v33, %s2105_s14  ;;  %694 = vrot.lane.b32.xlu1 %v420_v38, %s2105_s14 }
 0x176   : > { %v449_v39 = vpop.permute.xlu1 %448  ;;  %v424_v41 = vpop.permute.xlu0 %423 }
 0x177   : > { %399 = vrot.lane.b32.xlu0 %v393_v32, %s2098_s22  ;;  %743 = vrot.lane.b32.xlu1 %v422_v37, %s2105_s14  ;;  %v455_v40 = vsel %vm450_vm2, %v449_v39, 0 }
 0x178   : > { %1746 = vmatpush3.bf16.xpose.msra.mxu1 %v455_v40 }
 0x179   : > { %1751 = vmatprep.subr.bf16.mxu1 %v2097_v31 }
 0x17a   : > { %v396_v42 = vpop.permute.xlu1 %395 }
 0x17b   : > { %401 = vrot.lane.b32.xlu0 %v393_v32, %s2100_s29  ;;  %792 = vrot.lane.b32.xlu1 %v424_v41, %s2105_s14 }
 0x17e   : > { %v398_v43 = vpop.permute.xlu1 %397 }
 0x17f   : > { %403 = vrot.lane.b32.xlu0 %v393_v32, %s2104_s13  ;;  %407 = vrot.lane.b32.xlu1 %v393_v32, %s2106_s16 }
 0x180   : > { %1748 = vmatmul.mubr.msk.bf16.vlgmr.msra.gmra.mrb[0].mxu1 %vm450_vm2, %v393_v32 }
 0x181   : > { %1753 = vmatprep.mubr.msk.bf16.mxu1 %vm2102_vm1, %v2097_v31 }
 0x183   : > { %405 = vrot.lane.b32.xlu0 %v393_v32, %s2103_s9  ;;  %427 = vrot.lane.b32.xlu1 %v2240_v30, %s2099_s23  ;;  %s2111_s23 = smov 48  }
 0x1dd   : > { %v499_v44 = vpop.permute.xlu0 %498 }
 0x1de   : > { %v504_v45 = vsel %vm450_vm2, %v499_v44, 0 }
 0x1df   : > { %1752 = vmatpush3.bf16.xpose.msra.mxu1 %v504_v45 }
 0x1e0   : > { %1757 = vmatprep.subr.bf16.mxu1 %v2097_v31 }
 0x1e1   : > { %v548_v46 = vpop.permute.xlu0 %547  ;;  %v646_v47 = vpop.permute.xlu1 %645 }
 0x1e2   : > { %v651_v48 = vsel %vm450_vm2, %v646_v47, 0  ;;  %v553_v51 = vsel %vm450_vm2, %v548_v46, 0 }
 0x1e3   : > { %1770 = vmatpush3.bf16.xpose.msra.mxu0 %v651_v48 }
 0x1e4   : > { %1781 = vmatprep.subr.bf16.mxu0 %v2097_v31 }
 0x1e5   : > { %v597_v49 = vpop.permute.xlu0 %596  ;;  %v695_v50 = vpop.permute.xlu1 %694 }
 0x1e6   : > { %1754 = vmatmul.mubr.msk.bf16.vlgmr.msra.gmra.mrb[4].mxu1 %vm450_vm2, %v396_v42  ;;  %v602_v55 = vsel %vm450_vm2, %v597_v49, 0  ;;  %v700_v59 = vsel %vm450_vm2, %v695_v50, 0 }
 0x1e7   : > { %1758 = vmatpush3.bf16.xpose.msra.mxu1 %v553_v51  ;;  %1759 = vmatprep.mubr.msk.bf16.mxu1 %vm2102_vm1, %v2097_v31 }
 0x1e8   : > { %1763 = vmatprep.subr.bf16.mxu1 %v2097_v31 }
 0x1e9   : > { %v400_v52 = vpop.permute.xlu0 %399  ;;  %v744_v53 = vpop.permute.xlu1 %743 }
 0x1ea   : > { %v749_v56 = vsel %vm450_vm2, %v744_v53, 0 }
 0x1ed   : > { %v402_v54 = vpop.permute.xlu0 %401  ;;  %v793_v60 = vpop.permute.xlu1 %792 }
 0x1ee   : > { %1760 = vmatmul.mubr.msk.bf16.vlgmr.msra.gmra.mrb[8].mxu1 %vm450_vm2, %v398_v43  ;;  %1772 = vmatmul.mubr.msk.bf16.vlgmr.msra.gmra.mrb[4].mxu0 %vm450_vm2, %v402_v54  ;;  %v798_v61 = vsel %vm450_vm2, %v793_v60, 0 }
 0x1ef   : > { %1782 = vmatpush3.bf16.xpose.msra.mxu0 %v749_v56  ;;  %1764 = vmatpush3.bf16.xpose.msra.mxu1 %v602_v55 }
 0x1f0   : > { %1783 = vmatprep.mubr.msk.bf16.mxu0 %vm2102_vm1, %v2097_v31  ;;  %1793 = vmatprep.subr.bf16.mxu0 %v2097_v31 }
 0x1f1   : > { %v404_v57 = vpop.permute.xlu0 %403  ;;  %1765 = vmatprep.mubr.msk.bf16.mxu1 %vm2102_vm1, %v2097_v31  ;;  %1775 = vmatprep.subr.bf16.mxu1 %v2097_v31  ;;  %v408_v62 = vpop.permute.xlu1 %407 }
 0x1f5   : > { %v406_v58 = vpop.permute.xlu0 %405  ;;  %v428_v63 = vpop.permute.xlu1 %427 }
 0x1f6   : > { %1766 = vmatmul.mubr.msk.bf16.vlgmr.msra.gmra.mrb[12].mxu1 %vm450_vm2, %v400_v52  ;;  %1784 = vmatmul.mubr.msk.bf16.vlgmr.msra.gmra.mrb[8].mxu0 %vm450_vm2, %v406_v58 }
 0x1f7   : > { %1794 = vmatpush3.bf16.msra.mxu0 %v2240_v30  ;;  %1776 = vmatpush3.bf16.xpose.msra.mxu1 %v700_v59 }
 0x1f8   : > { %1777 = vmatprep.mubr.msk.bf16.mxu1 %vm2102_vm1, %v2097_v31  ;;  %1787 = vmatprep.subr.bf16.mxu1 %v2097_v31 }
 0x1f9   : > { %1795 = vmatprep.mubr.msk.bf16.mxu0 %vm2102_vm1, %v2097_v31  ;;  %1805 = vmatprep.subr.bf16.mxu0 %v2097_v31 }
 0x1fe   : > { %1778 = vmatmul.mubr.msk.bf16.vlgmr.msra.gmra.mrb[16].mxu1 %vm450_vm2, %v404_v57 }
 0x1ff   : > { %1788 = vmatpush3.bf16.xpose.msra.mxu1 %v798_v61  ;;  %1789 = vmatprep.mubr.msk.bf16.mxu1 %vm2102_vm1, %v2097_v31 }
 0x200   : > { %1799 = vmatprep.subr.bf16.mxu1 %v2097_v31 }
 0x206   : > { %1790 = vmatmul.mubr.msk.bf16.vlgmr.msra.gmra.mrb[20].mxu1 %vm450_vm2, %v408_v62 }
 0x207   : > { %1800 = vmatpush3.bf16.msra.mxu1 %v428_v63  ;;  %1801 = vmatprep.mubr.msk.bf16.mxu1 %vm2102_vm1, %v2097_v31 }
 0x208   : > { %1811 = vmatprep.subr.bf16.mxu1 %v2097_v31 }
 0x253   : > { %v2307_v0 = vpop.f32.mrb[0].mxu1 }
 0x254   : > { %v1749_v1 = vpop.f32.mrb[1].mxu1  ;;  %v842_v2 = vsel %vm841_vm3, %v2307_v0, -inf }
 0x255   : > { %843 = vmax.xlane.f32.xlu0 %v842_v2  ;;  %v2311_v3 = vpop.f32.mrb[2].mxu1 }
 0x256   : > { %v1750_v4 = vpop.f32.mrb[3].mxu1  ;;  %v845_v5 = vsel %vm841_vm3, %v2311_v3, -inf }
 0x257   : > { %846 = vmax.xlane.f32.xlu1 %v845_v5 }
 0x2b9   : > { %v2315_v6 = vpop.f32.mrb[4].mxu1 }
 0x2ba   : > { %v1755_v7 = vpop.f32.mrb[5].mxu1  ;;  %v848_v8 = vsel %vm841_vm3, %v2315_v6, -inf }
 0x2bb   : > { %849 = vmax.xlane.f32.xlu0 %v848_v8  ;;  %v2319_v9 = vpop.f32.mrb[6].mxu1 }
 0x2bc   : > { %v1756_v10 = vpop.f32.mrb[7].mxu1  ;;  %v851_v11 = vsel %vm841_vm3, %v2319_v9, -inf }
 0x2bf   : > { %852 = vmax.xlane.f32.xlu0 %v851_v11 }
 0x2c1   : > { %v2323_v12 = vpop.f32.mrb[8].mxu1  ;;  %v2325_v13 = vpop.f32.mrb[4].mxu0 }
 0x2c2   : > { %v1761_v14 = vpop.f32.mrb[9].mxu1  ;;  %v1773_v15 = vpop.f32.mrb[5].mxu0  ;;  %v866_v16 = vsel %vm841_vm3, %v2325_v13, -inf  ;;  %v854_v22 = vsel %vm841_vm3, %v2323_v12, -inf }
 0x2c3   : > { %v2329_v17 = vpop.f32.mrb[6].mxu0  ;;  %867 = vmax.xlane.f32.xlu1 %v866_v16  ;;  %v2331_v18 = vpop.f32.mrb[10].mxu1 }
 0x2c4   : > { %v1762_v19 = vpop.f32.mrb[11].mxu1  ;;  %v1774_v20 = vpop.f32.mrb[7].mxu0  ;;  %v869_v21 = vsel %vm841_vm3, %v2329_v17, -inf  ;;  %v857_v23 = vsel %vm841_vm3, %v2331_v18, -inf }
 0x2c5   : > { %870 = vmax.xlane.f32.xlu0 %v869_v21 }
 0x2c7   : > { %855 = vmax.xlane.f32.xlu1 %v854_v22 }
 0x2c9   : > { %v2339_v24 = vpop.f32.mrb[8].mxu0  ;;  %858 = vmax.xlane.f32.xlu0 %v857_v23  ;;  %v2341_v25 = vpop.f32.mrb[12].mxu1 }
 0x2ca   : > { %v1767_v26 = vpop.f32.mrb[13].mxu1  ;;  %v1785_v27 = vpop.f32.mrb[9].mxu0  ;;  %v878_v28 = vsel %vm841_vm3, %v2339_v24, -inf  ;;  %v860_v36 = vsel %vm841_vm3, %v2341_v25, -inf }
 0x2cb   : > { %v2345_v29 = vpop.f32.mrb[10].mxu0  ;;  %879 = vmax.xlane.f32.xlu1 %v878_v28  ;;  %v2347_v32 = vpop.f32.mrb[14].mxu1 }
 0x2cc   : > { %v1768_v33 = vpop.f32.mrb[15].mxu1  ;;  %v1786_v34 = vpop.f32.mrb[11].mxu0  ;;  %v881_v35 = vsel %vm841_vm3, %v2345_v29, -inf  ;;  %v863_v37 = vsel %vm841_vm3, %v2347_v32, -inf }
 0x2cd   : > { %882 = vmax.xlane.f32.xlu0 %v881_v35 }
 0x2cf   : > { %861 = vmax.xlane.f32.xlu1 %v860_v36 }
 0x2d1   : > { %864 = vmax.xlane.f32.xlu0 %v863_v37  ;;  %v2355_v38 = vpop.f32.mrb[16].mxu1 }
 0x2d2   : > { %v1779_v39 = vpop.f32.mrb[17].mxu1  ;;  %v872_v40 = vsel %vm841_vm3, %v2355_v38, -inf }
 0x2d3   : > { %873 = vmax.xlane.f32.xlu1 %v872_v40  ;;  %v2359_v41 = vpop.f32.mrb[18].mxu1 }
 0x2d4   : > { %v1780_v42 = vpop.f32.mrb[19].mxu1  ;;  %v875_v43 = vsel %vm841_vm3, %v2359_v41, -inf }
 0x2d5   : > { %876 = vmax.xlane.f32.xlu0 %v875_v43 }
 0x2d9   : > { %v2363_v44 = vpop.f32.mrb[20].mxu1 }
 0x2da   : > { %v1791_v45 = vpop.f32.mrb[21].mxu1  ;;  %v884_v46 = vsel %vm841_vm3, %v2363_v44, -inf }
 0x2db   : > { %885 = vmax.xlane.f32.xlu1 %v884_v46  ;;  %v2367_v47 = vpop.f32.mrb[22].mxu1 }
 0x2dc   : > { %v1792_v48 = vpop.f32.mrb[23].mxu1  ;;  %v887_v49 = vsel %vm841_vm3, %v2367_v47, -inf }
 0x2dd   : > { %888 = vmax.xlane.f32.xlu0 %v887_v49 }
 0x2e2   : > { %v844_v51 = vpop.xlane.xlu0 %843 }
 0x2e3   : > { %v890_v53 = vsub.f32 %v2307_v0, %v844_v51 }
 0x2e4   : > { %v847_v50 = vpop.xlane.xlu1 %846 }
 0x2e5   : > { %v891_v52 = vsub.f32 %v2311_v3, %v847_v50  ;;  %v906_v55 = vmul.f32 1.442695, %v890_v53 }
 0x2e7   : > { %v908_v54 = vmul.f32 1.442695, %v891_v52 }
 0x2e9   : > { %1962 = vpow2.f32 %v908_v54 }
 0x2ea   : > { %1964 = vpow2.f32 %v906_v55 }
 0x2ec   : > { %433 = vrot.lane.b32.xlu1 %v2240_v30, %s2098_s22  ;;  %s2110_s22 = smov 24  }
 0x2f0   : > { %436 = vrot.lane.b32.xlu1 %v2240_v30, %s2100_s29 }
 0x2f3   : > { %430 = vrot.lane.b32.xlu0 %v2240_v30, %s2101_s8  ;;  %v2379_v56 = vpop.eup %1962 }
 0x2f4   : > { %v2381_v57 = vpop.eup %1964  ;;  %v941_v58 = vsel %vm841_vm3, %v2379_v56, 0.0 }
 0x2f5   : > { %v938_v59 = vsel %vm841_vm3, %v2381_v57, 0.0 }
 0x312   : > { %942 = vadd.xlane.f32.xlu0 %v941_v58 }
 0x314   : > { %939 = vadd.xlane.f32.xlu1 %v938_v59 }
 0x348   : > { %v850_v60 = vpop.xlane.xlu0 %849 }
 0x349   : > { %v892_v61 = vsub.f32 %v2315_v6, %v850_v60 }
 0x34b   : > { %v910_v62 = vmul.f32 1.442695, %v892_v61 }
 0x34c   : > { %v853_v63 = vpop.xlane.xlu0 %852 }
 0x34d   : > { %1966 = vpow2.f32 %v910_v62  ;;  %v893_v0 = vsub.f32 %v2319_v9, %v853_v63 }
 0x34f   : > { %v912_v1 = vmul.f32 1.442695, %v893_v0 }
 0x350   : > { %v868_v2 = vpop.xlane.xlu1 %867 }
 0x351   : > { %1968 = vpow2.f32 %v912_v1  ;;  %v898_v3 = vsub.f32 %v2325_v13, %v868_v2 }
 0x352   : > { %v871_v4 = vpop.xlane.xlu0 %870 }
 0x353   : > { %v922_v5 = vmul.f32 1.442695, %v898_v3  ;;  %v899_v7 = vsub.f32 %v2329_v17, %v871_v4 }
 0x354   : > { %v856_v8 = vpop.xlane.xlu1 %855 }
 0x355   : > { %1970 = vpow2.f32 %v922_v5  ;;  %v924_v10 = vmul.f32 1.442695, %v899_v7  ;;  %v894_v11 = vsub.f32 %v2323_v12, %v856_v8 }
 0x356   : > { %v859_v6 = vpop.xlane.xlu0 %858 }
 0x357   : > { %v2392_v14 = vpop.eup %1966  ;;  %1972 = vpow2.f32 %v924_v10  ;;  %v914_v15 = vmul.f32 1.442695, %v894_v11  ;;  %v895_v9 = vsub.f32 %v2331_v18, %v859_v6 }
 0x358   : > { %v880_v16 = vpop.xlane.xlu1 %879  ;;  %v944_v13 = vsel %vm841_vm3, %v2392_v14, 0.0 }
 0x359   : > { %1974 = vpow2.f32 %v914_v15  ;;  %v916_v19 = vmul.f32 1.442695, %v895_v9  ;;  %v902_v17 = vsub.f32 %v2339_v24, %v880_v16  ;;  %945 = vadd.xlane.f32.xlu1 %v944_v13 }
 0x35a   : > { %v883_v20 = vpop.xlane.xlu0 %882 }
 0x35b   : > { %v2398_v21 = vpop.eup %1968  ;;  %1976 = vpow2.f32 %v916_v19  ;;  %v930_v12 = vmul.f32 1.442695, %v902_v17  ;;  %v903_v22 = vsub.f32 %v2345_v29, %v883_v20 }
 0x35c   : > { %v862_v23 = vpop.xlane.xlu1 %861  ;;  %v947_v18 = vsel %vm841_vm3, %v2398_v21, 0.0 }
 0x35d   : > { %1978 = vpow2.f32 %v930_v12  ;;  %v932_v26 = vmul.f32 1.442695, %v903_v22  ;;  %v896_v27 = vsub.f32 %v2341_v25, %v862_v23  ;;  %948 = vadd.xlane.f32.xlu0 %v947_v18 }
 0x35e   : > { %v865_v28 = vpop.xlane.xlu0 %864 }
 0x35f   : > { %v2404_v33 = vpop.eup %1970  ;;  %1980 = vpow2.f32 %v932_v26  ;;  %v918_v24 = vmul.f32 1.442695, %v896_v27  ;;  %v897_v34 = vsub.f32 %v2347_v32, %v865_v28 }
 0x360   : > { %v874_v35 = vpop.xlane.xlu1 %873  ;;  %v962_v29 = vsel %vm841_vm3, %v2404_v33, 0.0 }
 0x361   : > { %v2409_v36 = vpop.eup %1972  ;;  %1982 = vpow2.f32 %v918_v24  ;;  %v920_v37 = vmul.f32 1.442695, %v897_v34  ;;  %v900_v39 = vsub.f32 %v2355_v38, %v874_v35  ;;  %963 = vadd.xlane.f32.xlu1 %v962_v29 }
 0x362   : > { %v965_v25 = vsel %vm841_vm3, %v2409_v36, 0.0  ;;  %v877_v62 = vpop.xlane.xlu0 %876 }
 0x363   : > { %v2414_v40 = vpop.eup %1974  ;;  %1984 = vpow2.f32 %v920_v37  ;;  %v926_v42 = vmul.f32 1.442695, %v900_v39  ;;  %966 = vadd.xlane.f32.xlu0 %v965_v25  ;;  %v901_v63 = vsub.f32 %v2359_v41, %v877_v62 }
 0x364   : > { %v950_v32 = vsel %vm841_vm3, %v2414_v40, 0.0 }
 0x365   : > { %v2418_v43 = vpop.eup %1976  ;;  %1986 = vpow2.f32 %v926_v42  ;;  %951 = vadd.xlane.f32.xlu1 %v950_v32  ;;  %v928_v1 = vmul.f32 1.442695, %v901_v63 }
 0x366   : > { %v953_v45 = vsel %vm841_vm3, %v2418_v43, 0.0 }
 0x367   : > { %v2422_v38 = vpop.eup %1978  ;;  %954 = vadd.xlane.f32.xlu0 %v953_v45 }
 0x368   : > { %v886_v46 = vpop.xlane.xlu1 %885  ;;  %v974_v48 = vsel %vm841_vm3, %v2422_v38, 0.0 }
 0x369   : > { %v2426_v49 = vpop.eup %1980  ;;  %v904_v50 = vsub.f32 %v2363_v44, %v886_v46  ;;  %975 = vadd.xlane.f32.xlu1 %v974_v48 }
 0x36a   : > { %v977_v51 = vsel %vm841_vm3, %v2426_v49, 0.0  ;;  %v889_v0 = vpop.xlane.xlu0 %888 }
 0x36b   : > { %v2431_v52 = vpop.eup %1982  ;;  %v934_v53 = vmul.f32 1.442695, %v904_v50  ;;  %978 = vadd.xlane.f32.xlu0 %v977_v51  ;;  %v905_v2 = vsub.f32 %v2367_v47, %v889_v0 }
 0x36c   : > { %v956_v54 = vsel %vm841_vm3, %v2431_v52, 0.0  ;;  %v434_v4 = vpop.permute.xlu1 %433 }
 0x36d   : > { %v2435_v55 = vpop.eup %1984  ;;  %1988 = vpow2.f32 %v934_v53  ;;  %957 = vadd.xlane.f32.xlu1 %v956_v54  ;;  %v936_v3 = vmul.f32 1.442695, %v905_v2 }
 0x36e   : > { %v959_v58 = vsel %vm841_vm3, %v2435_v55, 0.0  ;;  %1990 = vpow2.f32 %v928_v1  ;;  %v431_v5 = vpop.permute.xlu0 %430 }
 0x36f   : > { %v2439_v59 = vpop.eup %1986  ;;  %960 = vadd.xlane.f32.xlu0 %v959_v58  ;;  %1992 = vpow2.f32 %v936_v3 }
 0x370   : > { %v968_v44 = vsel %vm841_vm3, %v2439_v59, 0.0  ;;  %v437_v7 = vpop.permute.xlu1 %436 }
 0x371   : > { %969 = vadd.xlane.f32.xlu1 %v968_v44 }
 0x377   : > { %v2443_v60 = vpop.eup %1988 }
 0x378   : > { %v980_v61 = vsel %vm841_vm3, %v2443_v60, 0.0  ;;  %v2453_v10 = vpop.eup %1990 }
 0x379   : > { %981 = vadd.xlane.f32.xlu1 %v980_v61  ;;  %v971_v6 = vsel %vm841_vm3, %v2453_v10, 0.0  ;;  %v2457_v41 = vpop.eup %1992 }
 0x37a   : > { %v983_v47 = vsel %vm841_vm3, %v2457_v41, 0.0 }
 0x385   : > { %439 = vrot.lane.b32.xlu0 %v2240_v30, %s2104_s13  ;;  %s1707_s13 = sshll.u32 %s2177_s28, 8 }
 0x386   : > { %s2554_s20 = scalar_lea.hbm %s2608_s7, %s1707_s13 }
 0x38a   : > { %442 = vrot.lane.b32.xlu1 %v2240_v30, %s2103_s9 }
 0x39f   : > { %v943_v8 = vpop.xlane.xlu0 %942 }
 0x3a0   : > { %1994 = vrcp.f32 %v943_v8 }
 0x3a1   : > { %v940_v11 = vpop.xlane.xlu1 %939 }
 0x3a2   : > { %1996 = vrcp.f32 %v940_v11 }
 0x3a4   : > { %972 = vadd.xlane.f32.xlu0 %v971_v6 }
 0x3a8   : > { %984 = vadd.xlane.f32.xlu0 %v983_v47 }
 0x3aa   : > { %v1995_v15 = vpop.eup %1994 }
 0x3ab   : > { %v1003_v16 = vmul.f32 %v1995_v15, %v2379_v56 }
 0x3ac   : > { %v1997_v9 = vpop.eup %1996 }
 0x3ad   : > { %v1002_v13 = vmul.f32 %v1997_v9, %v2381_v57 }
 0x3af   : > { %v1018_v19 = vpack.c.bf16 %v1003_v16, %v1002_v13 }
 0x3b1   : > { %1796 = vmatmul.mubr.msk.bf16.vlgmr.msra.gmra.mrb[12].mxu0 %vm841_vm3, %v1018_v19 }
 0x3b2   : > { %1806 = vmatpush3.bf16.msra.mxu0 %v431_v5  ;;  %1807 = vmatprep.mubr.msk.bf16.mxu0 %vm2102_vm1, %v2097_v31 }
 0x3b3   : > { %1817 = vmatprep.subr.bf16.mxu0 %v2097_v31 }
 0x3be   : > { %445 = vrot.lane.b32.xlu0 %v2240_v30, %s2106_s16 }
 0x3e6   : > { %v946_v17 = vpop.xlane.xlu1 %945 }
 0x3e7   : > { %1998 = vrcp.f32 %v946_v17 }
 0x3ea   : > { %v949_v20 = vpop.xlane.xlu0 %948 }
 0x3eb   : > { %2000 = vrcp.f32 %v949_v20 }
 0x3ee   : > { %v964_v12 = vpop.xlane.xlu1 %963 }
 0x3f0   : > { %v967_v56 = vpop.xlane.xlu0 %966 }
 0x3f1   : > { %v1999_v57 = vpop.eup %1998 }
 0x3f2   : > { %v952_v22 = vpop.xlane.xlu1 %951  ;;  %v1004_v26 = vmul.f32 %v1999_v57, %v2392_v14  ;;  %v1958_v57 = vld [vmem:[%s2604_s3] sm:$0xff]  }
 0x3f3   : > { %2002 = vrcp.f32 %v952_v22 }
 0x3f4   : > { %v955_v23 = vpop.xlane.xlu0 %954 }
 0x3f5   : > { %v2001_v18 = vpop.eup %2000  ;;  %2004 = vrcp.f32 %v955_v23 }
 0x3f6   : > { %v1005_v27 = vmul.f32 %v2001_v18, %v2398_v21  ;;  %v976_v28 = vpop.xlane.xlu1 %975  ;;  %2006 = vrcp.f32 %v967_v56 }
 0x3f7   : > { %2008 = vrcp.f32 %v964_v12 }
 0x3f8   : > { %v979_v24 = vpop.xlane.xlu0 %978  ;;  %v1019_v34 = vpack.c.bf16 %v1005_v27, %v1004_v26 }
 0x3fa   : > { %v958_v30 = vpop.xlane.xlu1 %957  ;;  %1802 = vmatmul.mubr.msk.bf16.vlgmr.msra.gmra.mrb[24].mxu1 %vm841_vm3, %v1019_v34 }
 0x3fb   : > { %2010 = vrcp.f32 %v958_v30  ;;  %1812 = vmatpush3.bf16.msra.mxu1 %v434_v4  ;;  %1813 = vmatprep.mubr.msk.bf16.mxu1 %vm2102_vm1, %v2097_v31 }
 0x3fc   : > { %v961_v35 = vpop.xlane.xlu0 %960  ;;  %1823 = vmatprep.subr.bf16.mxu1 %v2097_v31 }
 0x3fd   : > { %v2003_v29 = vpop.eup %2002  ;;  %2012 = vrcp.f32 %v961_v35 }
 0x3fe   : > { %v1006_v21 = vmul.f32 %v2003_v29, %v2414_v40  ;;  %2014 = vrcp.f32 %v979_v24  ;;  %v970_v39 = vpop.xlane.xlu1 %969 }
 0x3ff   : > { %v2005_v14 = vpop.eup %2004  ;;  %2016 = vrcp.f32 %v976_v28 }
 0x400   : > { %v1007_v37 = vmul.f32 %v2005_v14, %v2418_v43  ;;  %v2007_v42 = vpop.eup %2006  ;;  %v440_v61 = vpop.permute.xlu0 %439  ;;  %2018 = vrcp.f32 %v970_v39  ;;  %v1959_v39 = vld [vmem:[%s2604_s3 + $0x8] sm:$0xff]  }
 0x401   : > { %v2009_v32 = vpop.eup %2008  ;;  %v1011_v46 = vmul.f32 %v2007_v42, %v2409_v36 }
 0x402   : > { %v1020_v25 = vpack.c.bf16 %v1007_v37, %v1006_v21  ;;  %v1010_v43 = vmul.f32 %v2009_v32, %v2404_v33 }
 0x404   : > { %1808 = vmatmul.mubr.msk.bf16.vlgmr.msra.gmra.mrb[16].mxu0 %vm841_vm3, %v1020_v25  ;;  %v1022_v58 = vpack.c.bf16 %v1011_v46, %v1010_v43  ;;  %v1960_v25 = vld [vmem:[%s2604_s3 + $0x10] sm:$0xff]  }
 0x405   : > { %v2011_v45 = vpop.eup %2010  ;;  %1818 = vmatpush3.bf16.msra.mxu0 %v437_v7  ;;  %1819 = vmatprep.mubr.msk.bf16.mxu0 %vm2102_vm1, %v2097_v31 }
 0x406   : > { %v982_v48 = vpop.xlane.xlu1 %981  ;;  %1829 = vmatprep.subr.bf16.mxu0 %v2097_v31  ;;  %v1008_v50 = vmul.f32 %v2011_v45, %v2431_v52  ;;  %v1961_v45 = vld [vmem:[%s2604_s3 + $0x18] sm:$0xff]  }
 0x407   : > { %v2013_v40 = vpop.eup %2012 }
 0x408   : > { %v1009_v51 = vmul.f32 %v2013_v40, %v2435_v55  ;;  %v2015_v44 = vpop.eup %2014 }
 0x409   : > { %v2017_v36 = vpop.eup %2016  ;;  %v1015_v62 = vmul.f32 %v2015_v44, %v2426_v49 }
 0x40a   : > { %v443_v53 = vpop.permute.xlu1 %442  ;;  %v1021_v54 = vpack.c.bf16 %v1009_v51, %v1008_v50  ;;  %v1014_v33 = vmul.f32 %v2017_v36, %v2422_v38  ;;  %v2019_v63 = vpop.eup %2018 }
 0x40b   : > { %v1012_v1 = vmul.f32 %v2019_v63, %v2439_v59 }
 0x40c   : > { %1814 = vmatmul.mubr.msk.bf16.vlgmr.msra.gmra.mrb[28].mxu1 %vm841_vm3, %v1021_v54  ;;  %1820 = vmatmul.mubr.msk.bf16.vlgmr.msra.gmra.mrb[20].mxu0 %vm841_vm3, %v1022_v58  ;;  %v1024_v52 = vpack.c.bf16 %v1015_v62, %v1014_v33 }
 0x40d   : > { %1824 = vmatpush3.bf16.msra.mxu1 %v440_v61  ;;  %1830 = vmatpush3.bf16.msra.mxu0 %v443_v53 }
 0x40e   : > { %1831 = vmatprep.mubr.msk.bf16.mxu0 %vm2102_vm1, %v2097_v31  ;;  %1825 = vmatprep.mubr.msk.bf16.mxu1 %vm2102_vm1, %v2097_v31 }
 0x40f   : > { %1835 = vmatprep.subr.bf16.mxu1 %v2097_v31  ;;  %1841 = vmatprep.subr.bf16.mxu0 %v2097_v31 }
 0x414   : > { %1832 = vmatmul.mubr.msk.bf16.vlgmr.msra.gmra.mrb[24].mxu0 %vm841_vm3, %v1024_v52 }
 0x415   : > { %1849 = vmatprep.mubr.msk.bf16.mxu0 %vm2102_vm1, %v2097_v31  ;;  %1842 = vmatpush3.bf16.msra.mxu0 %v1958_v57 }
 0x416   : > { %1843 = vmatprep.subr.bf16.mxu0 %v2097_v31 }
 0x419   : > { %1844 = vmatpush3.bf16.msra.mxu0 %v1959_v39 }
 0x41a   : > { %1845 = vmatprep.subr.bf16.mxu0 %v2097_v31 }
 0x41d   : > { %1846 = vmatpush3.bf16.msra.mxu0 %v1960_v25 }
 0x41e   : > { %1847 = vmatprep.subr.bf16.mxu0 %v2097_v31 }
 0x421   : > { %1848 = vmatpush3.bf16.msra.mxu0 %v1961_v45 }
 0x431   : > { %v973_v49 = vpop.xlane.xlu0 %972 }
 0x432   : > { %2020 = vrcp.f32 %v973_v49 }
 0x435   : > { %v985_v55 = vpop.xlane.xlu0 %984 }
 0x436   : > { %2022 = vrcp.f32 %v985_v55 }
 0x437   : > { %2024 = vrcp.f32 %v982_v48 }
 0x439   : > { %v446_v4 = vpop.permute.xlu0 %445 }
 0x43c   : > { %v2021_v0 = vpop.eup %2020 }
 0x43d   : > { %v1013_v2 = vmul.f32 %v2021_v0, %v2453_v10 }
 0x43f   : > { %v1023_v3 = vpack.c.bf16 %v1013_v2, %v1012_v1 }
 0x440   : > { %v2023_v38 = vpop.eup %2022 }
 0x441   : > { %1826 = vmatmul.mubr.msk.bf16.vlgmr.msra.gmra.mrb[32].mxu1 %vm841_vm3, %v1023_v3  ;;  %v2025_v5 = vpop.eup %2024  ;;  %v1017_v7 = vmul.f32 %v2023_v38, %v2457_v41 }
 0x442   : > { %1836 = vmatpush3.bf16.msra.mxu1 %v446_v4  ;;  %1837 = vmatprep.mubr.msk.bf16.mxu1 %vm2102_vm1, %v2097_v31  ;;  %v1016_v8 = vmul.f32 %v2025_v5, %v2443_v60 }
 0x444   : > { %v1025_v11 = vpack.c.bf16 %v1017_v7, %v1016_v8 }
 0x449   : > { %1838 = vmatmul.mubr.msk.bf16.vlgmr.msra.gmra.mrb[36].mxu1 %vm841_vm3, %v1025_v11 }
 0x484   : > { %v2506_v59 = vpop.f32.mrb[12].mxu0 }
 0x485   : > { %v1797_v10 = vpop.f32.mrb[13].mxu0 }
 0x486   : > { %v2508_v6 = vpop.f32.mrb[14].mxu0 }
 0x487   : > { %v1798_v47 = vpop.f32.mrb[15].mxu0 }
 0x4cd   : > { %v1107_v15 = vpop.f32.mrb[24].mxu1 }
 0x4ce   : > { %v1803_v9 = vpop.f32.mrb[25].mxu1 }
 0x4cf   : > { %v1110_v16 = vpop.f32.mrb[26].mxu1 }
 0x4d0   : > { %v1911_v13 = vpack.i.bf16 %v1110_v16, %v1107_v15  ;;  %v1804_v19 = vpop.f32.mrb[27].mxu1 }
 0x4d2   : > { %1912 = vrot.lane.b32.xlu1 %v1911_v13, %s2107_s17 }
 0x4d7   : > { %v1151_v41 = vpop.f32.mrb[16].mxu0 }
 0x4d8   : > { %v1809_v17 = vpop.f32.mrb[17].mxu0 }
 0x4d9   : > { %v1154_v60 = vpop.f32.mrb[18].mxu0 }
 0x4da   : > { %v1916_v20 = vpack.i.bf16 %v1154_v60, %v1151_v41  ;;  %v1810_v12 = vpop.f32.mrb[19].mxu0 }
 0x4dc   : > { %1917 = vrot.lane.b32.xlu0 %v1916_v20, %s2108_s19  ;;  %s2112_s19 = smov 40  }
 0x4df   : > { %v1195_v56 = vpop.f32.mrb[28].mxu1  ;;  %v1239_v22 = vpop.f32.mrb[20].mxu0 }
 0x4e0   : > { %v1815_v23 = vpop.f32.mrb[29].mxu1  ;;  %v1821_v18 = vpop.f32.mrb[21].mxu0 }
 0x4e1   : > { %v1198_v26 = vpop.f32.mrb[30].mxu1  ;;  %v1242_v27 = vpop.f32.mrb[22].mxu0 }
 0x4e2   : > { %v1921_v28 = vpack.i.bf16 %v1198_v26, %v1195_v56  ;;  %v1926_v24 = vpack.i.bf16 %v1242_v27, %v1239_v22  ;;  %v1816_v34 = vpop.f32.mrb[31].mxu1  ;;  %v1822_v30 = vpop.f32.mrb[23].mxu0  ;;  %v1694_v22 = vld [vmem:[%s2605_s4] ss:$0 sm:$0xff] }
 0x4e4   : > { %1927 = vrot.lane.b32.xlu0 %v1926_v24, %s2109_s21  ;;  %1922 = vrot.lane.b32.xlu1 %v1921_v28, %s2110_s22  ;;  %v2030_v24 = vld [vmem:[%s2229_s18] sm:$0xff]  ;;  %s2114_s22 = smov [#allocation2]  }
 0x4e7   : > { %v1327_v35 = vpop.f32.mrb[24].mxu0 }
 0x4e8   : > { %v1833_v29 = vpop.f32.mrb[25].mxu0 }
 0x4e9   : > { %v1330_v14 = vpop.f32.mrb[26].mxu0 }
 0x4ea   : > { %v1936_v21 = vpack.i.bf16 %v1330_v14, %v1327_v35  ;;  %v1834_v37 = vpop.f32.mrb[27].mxu0  ;;  %v2031_v35 = vld [vmem:[%s2229_s18 + $0x8] sm:$0xff]  ;;  %s270_s18 = sand.u32 1, %s2086_s25  }
 0x4eb   : > { %s1666_s29 = sshll.u32 %s270_s18, 4  ;;  %s2559_s21 = scalar_lea.sflag [#allocation3], %s270_s18 }
 0x4ec   : > { %1937 = vrot.lane.b32.xlu0 %v1936_v21, %s2111_s23  ;;  %s272_s14 = scalar_lea.vmem [#allocation2], %s1666_s29  ;;  %s2036_s23 = sshll.u32 %s2114_s22, 4  ;;  %s2037_s23 = int_to_ptr.vmem [resolvable:$false] %s2036_s23 }
 0x4ed   : > { %s1600_s16 = sshll.u32 %s272_s14, 4  ;;  %s2038_s29 = scalar_lea.vmem %s2037_s23, 512  ;;  %s2556_s16 = int_to_ptr.vmem [resolvable:$true] %s1600_s16 }
 0x4ee   : > { %s2032_s28 = scalar_lea.vmem %s2556_s16, 256  ;;  %p2039_p0 = scmp.lt.s32.totalorder %s2556_s16, %s2037_s23 }
 0x4ef   : > { %p2033_p11 = scmp.ne.s32.totalorder %s2556_s16, %s2032_s28  ;;  %p2040_p1 = scmp.lt.s32.totalorder %s2038_s29, %s2032_s28 }
 0x4f1   : > { %p2034_p12 = pnand %p2033_p11, %p2194_p5  ;;  %p2041_p2 = por %p2040_p1, %p2039_p0 }
 0x4f3   : > { %p2035_p13 = pneg %p2034_p12 }
 0x4f5   : > { %p2042_p3 = pnand %p2041_p2, %p2035_p13 }
 0x514   : > { %v1283_v42 = vpop.f32.mrb[32].mxu1 }
 0x515   : > { %v1827_v32 = vpop.f32.mrb[33].mxu1 }
 0x516   : > { %v1286_v46 = vpop.f32.mrb[34].mxu1 }
 0x517   : > { %v1931_v48 = vpack.i.bf16 %v1286_v46, %v1283_v42  ;;  %v1828_v40 = vpop.f32.mrb[35].mxu1 }
 0x519   : > { %1932 = vrot.lane.b32.xlu1 %v1931_v48, %s2112_s19 }
 0x51c   : > { %v1371_v43 = vpop.f32.mrb[36].mxu1 }
 0x51d   : > { %v1839_v50 = vpop.f32.mrb[37].mxu1 }
 0x51e   : > { %v1374_v51 = vpop.f32.mrb[38].mxu1 }
 0x51f   : > { %v1941_v53 = vpack.i.bf16 %v1374_v51, %v1371_v43  ;;  %v1840_v54 = vpop.f32.mrb[39].mxu1 }
 0x521   : > { %1942 = vrot.lane.b32.xlu1 %v1941_v53, %s2113_s15 }
 0x544   : > { %v1913_v58 = vpop.permute.xlu1 %1912 }
 0x545   : > { %v1915_v61 = vunpack.i.h.bf16 %v1913_v58  ;;  %v1914_v36 = vunpack.i.l.bf16 %v1913_v58 }
 0x547   : > { %v1435_v0 = vsel %vm450_vm2, %v2508_v6, %v1915_v61  ;;  %v1434_v1 = vsel %vm450_vm2, %v2506_v59, %v1914_v36  ;;  %v1701_v36 = vld [vmem:[%s2607_s6] ss:$0 sm:$0xff] }
 0x54e   : > { %v1918_v31 = vpop.permute.xlu0 %1917 }
 0x54f   : > { %v1920_v62 = vunpack.i.h.bf16 %v1918_v31  ;;  %v1919_v33 = vunpack.i.l.bf16 %v1918_v31 }
 0x551   : > { %v1436_v2 = vsel %vm841_vm3, %v1434_v1, %v1919_v33  ;;  %v1437_v3 = vsel %vm841_vm3, %v1435_v0, %v1920_v62 }
 0x556   : > { %v1923_v44 = vpop.permute.xlu1 %1922  ;;  %v1928_v52 = vpop.permute.xlu0 %1927 }
 0x557   : > { %v1925_v49 = vunpack.i.h.bf16 %v1923_v44  ;;  %v1924_v55 = vunpack.i.l.bf16 %v1923_v44  ;;  %v1930_v38 = vunpack.i.h.bf16 %v1928_v52  ;;  %v1929_v4 = vunpack.i.l.bf16 %v1928_v52  ;;  %v1700_v44 = vld [vmem:[%s2606_s5] ss:$0 sm:$0xff] }
 0x559   : > { %v1440_v5 = vsel %vm1438_vm4, %v1437_v3, %v1925_v49  ;;  %v1439_v7 = vsel %vm1438_vm4, %v1436_v2, %v1924_v55 }
 0x55a   : > { %v1442_v47 = vsel %vm1441_vm5, %v1439_v7, %v1929_v4  ;;  %v1443_v15 = vsel %vm1441_vm5, %v1440_v5, %v1930_v38 }
 0x55e   : > { %v1938_v10 = vpop.permute.xlu0 %1937 }
 0x55f   : > { %v1940_v16 = vunpack.i.h.bf16 %v1938_v10  ;;  %v1939_v59 = vunpack.i.l.bf16 %v1938_v10 }
 0x58b   : > { %v1933_v63 = vpop.permute.xlu1 %1932 }
 0x58c   : > { %v1935_v8 = vunpack.i.h.bf16 %v1933_v63  ;;  %v1934_v11 = vunpack.i.l.bf16 %v1933_v63 }
 0x58e   : > { %v1446_v9 = vsel %vm1444_vm6, %v1443_v15, %v1935_v8  ;;  %v1445_v6 = vsel %vm1444_vm6, %v1442_v47, %v1934_v11 }
 0x58f   : > { %v1448_v17 = vsel %vm1447_vm7, %v1445_v6, %v1939_v59  ;;  %v1449_v60 = vsel %vm1447_vm7, %v1446_v9, %v1940_v16 }
 0x593   : > { %v1943_v13 = vpop.permute.xlu1 %1942 }
 0x594   : > { %v1945_v19 = vunpack.i.h.bf16 %v1943_v13  ;;  %v1944_v41 = vunpack.i.l.bf16 %v1943_v13 }
 0x596   : > { %v1452_v20 = vsel %vm1450_vm8, %v1449_v60, %v1945_v19  ;;  %v1451_v12 = vsel %vm1450_vm8, %v1448_v17, %v1944_v41 }
 0x597   : > { %v1453_v56 = vpack.c.bf16 %v1452_v20, %v1451_v12 }
 0x599   : > { %1850 = vmatmul.mubr.msk.bf16.vlgmr.msra.gmra.mrb[28].mxu0 %vm344_vm0, %v1453_v56 }
 0x66c   : > { %v1530_v57 = vpop.f32.mrb[28].mxu0 }
 0x66d   : > { %v1531_v23 = vadd.f32 %v1694_v22, %v1530_v57  ;;  %v1851_v18 = vpop.f32.mrb[29].mxu0 }
 0x66e   : > { %v1533_v26 = vpop.f32.mrb[30].mxu0 }
 0x66f   : > { %v1534_v27 = vadd.f32 %v1694_v22, %v1533_v26  ;;  %v1852_v28 = vpop.f32.mrb[31].mxu0  ;;  %v1537_v34 = vadd.f32 %v2030_v24, %v1531_v23 }
 0x671   : > { %v1539_v30 = vsel %vm344_vm0, %v1537_v34, 0.0  ;;  %v1538_v29 = vadd.f32 %v2031_v35, %v1534_v27 }
 0x672   : > { %1540 = vadd.xlane.f32.xlu0 %v1539_v30 }
 0x673   : > { %v1542_v14 = vsel %vm344_vm0, %v1538_v29, 0.0 }
 0x674   : > { %1543 = vadd.xlane.f32.xlu1 %v1542_v14 }
 0x6ff   : > { %v1541_v21 = vpop.xlane.xlu0 %1540 }
 0x700   : > { %v1546_v37 = vmul.f32 0.015625, %v1541_v21 }
 0x701   : > { %v1544_v39 = vpop.xlane.xlu1 %1543 }
 0x702   : > { %v1548_v25 = vsub.f32 %v1537_v34, %v1546_v37  ;;  %v1547_v42 = vmul.f32 0.015625, %v1544_v39 }
 0x704   : > { %v1549_v32 = vsub.f32 %v1538_v29, %v1547_v42  ;;  %v1550_v45 = vmul.f32 %v1548_v25, %v1548_v25 }
 0x706   : > { %v1552_v46 = vsel %vm344_vm0, %v1550_v45, 0.0  ;;  %v1551_v48 = vmul.f32 %v1549_v32, %v1549_v32 }
 0x707   : > { %1553 = vadd.xlane.f32.xlu0 %v1552_v46 }
 0x708   : > { %v1555_v40 = vsel %vm344_vm0, %v1551_v48, 0.0 }
 0x70b   : > { %1556 = vadd.xlane.f32.xlu0 %v1555_v40 }
 0x794   : > { %v1554_v43 = vpop.xlane.xlu0 %1553 }
 0x795   : > { %v1558_v50 = vmul.f32 0.015625, %v1554_v43 }
 0x797   : > { %v1560_v51 = vadd.f32 1e-05, %v1558_v50 }
 0x798   : > { %v1557_v53 = vpop.xlane.xlu0 %1556 }
 0x799   : > { %2026 = vrsqrt.f32 %v1560_v51  ;;  %v1559_v54 = vmul.f32 0.015625, %v1557_v53 }
 0x79b   : > { %v1561_v58 = vadd.f32 1e-05, %v1559_v54 }
 0x79d   : > { %2028 = vrsqrt.f32 %v1561_v58 }
 0x7a3   : > { %v2027_v31 = vpop.eup %2026 }
 0x7a4   : > { %v1564_v61 = vmul.f32 %v2027_v31, %v1548_v25 }
 0x7a6   : > { %v1573_v62 = vmul.f32 %v1700_v44, %v1564_v61 }
 0x7a7   : > { %v2029_v33 = vpop.eup %2028 }
 0x7a8   : > { %v1565_v52 = vmul.f32 %v2029_v33, %v1549_v32  ;;  %v1582_v49 = vadd.f32 %v1701_v36, %v1573_v62 }
 0x7aa   : > { %v1574_v55 = vmul.f32 %v1700_v44, %v1565_v52  ;;  %1584 = vst.msk [vmem:[%s272_s14] sm:$0xff] %vm344_vm0, %v1582_v49 }
 0x7ac   : > { %v1583_v63 = vadd.f32 %v1701_v36, %v1574_v55 }
 0x7ae   : > { %1585 = vst.msk [vmem:[%s272_s14 + $0x8] sm:$0xff] %vm344_vm0, %v1583_v63 }
 0x7af   : > { %2045 = shalt.err (!%p2042_p3)
}
 0x7b0   : > { %s2046_s18 = scalar_lea.hbm %s2554_s20, 256  ;;  %s2050_s13 = scalar_lea.hbm %s2608_s7, 512 }
 0x7b1   : > { %p2047_p4 = scmp.ne.s32.totalorder %s2554_s20, %s2046_s18  ;;  %p2051_p9 = scmp.lt.u32.totalorder %s2554_s20, %s2608_s7 }
 0x7b2   : > { %p2052_p10 = scmp.lt.u32.totalorder %s2050_s13, %s2046_s18  ;;  %p2054_p12 = scmp.lt.u32.totalorder %s2046_s18, %s2554_s20 }
 0x7b3   : > { %p2048_p7 = pnand %p2047_p4, %p2194_p5 }
 0x7b4   : > { %p2053_p11 = por %p2052_p10, %p2051_p9 }
 0x7b5   : > { %p2049_p8 = pneg %p2048_p7 }
 0x7b6   : > { %p2055_p13 = por %p2054_p12, %p2053_p11 }
 0x7b8   : > { %p2056_p0 = pnand %p2055_p13, %p2049_p8 }
 0x7ba   : > { %2059 = shalt.err (!%p2056_p0)
}
 0x7bb   : > { %s2115_s15 = smov 128  }
 0x7bc   : > { %1853 = dma.vmem_to_hbm [thread:$0]  (%p2194_p5), %s2556_s16, 256, %s2554_s20, %s2559_s21, %s2115_s15, %s2115_s15, %s2107_s17  }
 0x7bd PF: > { %p1859_p1 = scmp.ge.s32.totalorder %s2094_s27, 2  ;;  %s1615_s28 = sand.u32 1, %s2082_s24  }
 0x7be   : > { %s1616_s22 = scalar_lea.sflag [#allocation3], %s1615_s28 }
 0x7bf   : > { %p1856_p2 = pnand %p1859_p1, %p2198_p6 }
 0x7c1   : > { %2077 = dma.done.wait (!%p1856_p2), %s1616_s22, 256  }
 0x7c2   : > { %2079 = vsyncadd (!%p1856_p2), %s1616_s22, 4294967040  ;;  %p17_p3 = scmp.ge.s32.totalorder %s2181_s30, 4   ;;  %s2611_s24 = smov %s2086_s25 }
 0x7c3   : > { %s2612_s25 = smov %s2090_s26  ;;  %s2613_s26 = smov %s2192_s10 }
 0x7c4   : > { %s2614_s27 = smov %s2181_s30  ;;  %19 = sbr.rel (!%p17_p3) target bundleno = 3 (0x3), region = 83 }
 0x7cb   :  { %1621 = vsyncpa [#allocation3], 1 }
 0x7cc   :  { %1623 = vsyncpa [#allocation3 + $0x1], 1 }

</bundles_post_ra>
